<compile_context>
chip_gen: v7x
topology: tpu7x:2x2x1
jax: 0.10.0
libtpu: 0.0.40
codegen_flags: <defaults>
</compile_context>

<pallas_src>
import functools

import jax
import jax.numpy as jnp
from jax.experimental import pallas as pl
from jax.experimental.pallas import tpu as pltpu


# ----------------------------------------------------------------------------
# Kernel 1: 1x1 conv (bf16 MXU, f32 accumulate) + per-(image, hw-chunk)
# channel sum / sum-of-squares partials (resident accumulators).
# ----------------------------------------------------------------------------
def conv_stats_kernel(x_ref, w_ref, sum_ref, sq_ref, *, compute_dtype):
    t = pl.program_id(2)                       # innermost reduction axis

    @pl.when(t == 0)
    def _():
        sum_ref[...] = jnp.zeros_like(sum_ref)
        sq_ref[...] = jnp.zeros_like(sq_ref)

    xt = x_ref[0]                              # (Cin, hw_tile)
    if xt.dtype != jnp.dtype(compute_dtype):
        xt = xt.astype(compute_dtype)          # VPU cast in VMEM, no HBM copy
    # (Cout, Cin) @ (Cin, hw_tile) -> (Cout, hw_tile) on the MXU, f32 accumulate.
    y = jnp.dot(w_ref[...], xt, preferred_element_type=jnp.float32)
    sum_ref[...] += jnp.sum(y, axis=1, keepdims=True)[None, None]
    sq_ref[...] += jnp.sum(y * y, axis=1, keepdims=True)[None, None]


# ----------------------------------------------------------------------------
# Kernel 2: recompute conv with the BN-scale-folded weight, add shift, swish.
# ----------------------------------------------------------------------------
def conv_bn_swish_kernel(x_ref, w_ref, shift_ref, o_ref, *, swish, compute_dtype):
    xt = x_ref[0]
    if xt.dtype != jnp.dtype(compute_dtype):
        xt = xt.astype(compute_dtype)
    y = jnp.dot(w_ref[...], xt, preferred_element_type=jnp.float32)
    out = y + shift_ref[...]
    if swish:
        out = out * jax.nn.sigmoid(out)        # exp + reciprocal go to the EUP
    o_ref[...] = out[None].astype(o_ref.dtype)


# ----------------------------------------------------------------------------
# Generation-aware VMEM limit and tile picking.
# ----------------------------------------------------------------------------
def _vmem_limit_bytes():
    """Scoped-VMEM limit: half of physical VMEM, capped at 64 MiB, floored at 16 MiB."""
    phys = 64 * 1024 * 1024                    # conservative default (v7x per-TC)
    try:
        phys = int(getattr(pltpu.get_tpu_info(), "vmem_capacity_bytes", phys))
    except Exception:
        pass
    return int(max(16 * 1024 * 1024, min(phys // 2, 64 * 1024 * 1024)))


def _pick_hw_tile(HW, Cin, Cout, x_bytes, out_bytes, budget_bytes):
    """Largest lane-dense (multiple-of-128) hw tile within the VMEM budget.

    Budget per lane accounts for the double-buffered x and out blocks *and*
    the f32 (Cout, hw_tile) y intermediate plus one elementwise temporary.
    Caps at 2048 lanes (roofline saturates around 512-2048).  If HW has no
    clean multiple-of-128 divisor <= cap, return the tile that minimizes the
    zero-padding (the wrapper pads HW up to a multiple of the tile)."""
    per_lane = Cin * x_bytes * 2 + Cout * out_bytes * 2 + 2 * Cout * 4
    cap = budget_bytes // max(per_lane, 1)
    cap = int(max(128, min(2048, (cap // 128) * 128)))
    if HW <= cap:
        return HW                              # full-extent block, no padding
    best_t, best_waste = 128, (-HW) % 128
    t = 256
    while t <= cap:
        waste = (-HW) % t
        if waste <= best_waste:                # prefer larger tile on ties
            best_t, best_waste = t, waste
        t += 128
    return best_t


def _split_tiles(n_tiles, max_outer=4):
    """Split the hw-tile count into (parallel outer, arbitrary inner) so v7x's
    second TensorCore has pass-1 work even when N is small."""
    for d in range(min(max_outer, n_tiles), 0, -1):
        if n_tiles % d == 0:
            return d, n_tiles // d
    return 1, n_tiles


# ----------------------------------------------------------------------------
# Wrapper
# ----------------------------------------------------------------------------
def basic_block(x_nchw, w_oi, gamma, beta, *, swish=False, eps=1e-5,
                compute_dtype=jnp.bfloat16, out_dtype=None, hw_tile=None):
    """x_nchw: (N, Cin, H, W); w_oi: (Cout, Cin) 1x1-conv weight (no bias);
    gamma/beta: (Cout,).  Training-mode BatchNorm2d (batch statistics).
    Returns (N, Cout, H, W) in out_dtype (defaults to x's dtype)."""
    N, Cin, H, W = x_nchw.shape
    Cout = w_oi.shape[0]
    HW = H * W
    P = N * HW                                 # true element count per channel
    if out_dtype is None:
        out_dtype = x_nchw.dtype

    vmem_limit = _vmem_limit_bytes()
    x_bytes = jnp.dtype(x_nchw.dtype).itemsize
    o_bytes = jnp.dtype(out_dtype).itemsize
    if hw_tile is None:
        hw_tile = _pick_hw_tile(HW, Cin, Cout, x_bytes, o_bytes,
                                budget_bytes=int(vmem_limit * 0.6))

    n_tiles = pl.cdiv(HW, hw_tile)
    HW_pad = n_tiles * hw_tile

    # Native NCHW: pure reshape (no transpose, no dtype copy).  Channels sit on
    # sublanes, H*W on lanes, so every block/store is lane-dense.
    x = x_nchw.reshape(N, Cin, HW)
    if HW_pad != HW:
        # Zero padding is exact for the BN sums (1x1 conv of 0, no bias, is 0);
        # we still divide by the true count P and slice the pad off after pass 2.
        x = jnp.pad(x, ((0, 0), (0, 0), (0, HW_pad - HW)))

    w32 = w_oi.astype(jnp.float32)
    w = w32.astype(compute_dtype)              # pass-1 weight (bf16 MXU path)

    n_outer, n_inner = _split_tiles(n_tiles)

    # -------- Pass 1: conv + per-(image, hw-chunk) channel sum / sumsq partials.
    sums, sqs = pl.pallas_call(
        functools.partial(conv_stats_kernel, compute_dtype=compute_dtype),
        out_shape=(
            jax.ShapeDtypeStruct((N, n_outer, Cout, 1), jnp.float32),
            jax.ShapeDtypeStruct((N, n_outer, Cout, 1), jnp.float32),
        ),
        grid_spec=pltpu.PrefetchScalarGridSpec(
            num_scalar_prefetch=0,
            grid=(N, n_outer, n_inner),
            in_specs=[
                pl.BlockSpec((1, Cin, hw_tile),
                             lambda n, o, t: (n, 0, o * n_inner + t)),
                pl.BlockSpec((Cout, Cin), lambda n, o, t: (0, 0)),
            ],
            out_specs=(
                pl.BlockSpec((1, 1, Cout, 1), lambda n, o, t: (n, o, 0, 0)),
                pl.BlockSpec((1, 1, Cout, 1), lambda n, o, t: (n, o, 0, 0)),
            ),
        ),
        compiler_params=pltpu.CompilerParams(
            dimension_semantics=("parallel", "parallel", "arbitrary"),
            vmem_limit_bytes=vmem_limit,
        ),
    )(x, w)

    # Tiny glue: fold batch statistics into a scaled weight and a per-channel shift.
    # PyTorch BN (training mode) normalizes with the biased variance.
    ch_sum = jnp.sum(sums, axis=(0, 1))                    # (Cout, 1)
    ch_sq = jnp.sum(sqs, axis=(0, 1))                      # (Cout, 1)
    mean = ch_sum / P
    # TODO(synk): E[y^2]-mean^2 is fragile when |mean| >> std; a per-channel
    #             pre-shifted accumulation would be more robust than the clamp.
    var = jnp.maximum(ch_sq / P - mean * mean, 0.0)
    inv_std = jax.lax.rsqrt(var + eps)
    g = gamma.reshape(Cout, 1).astype(jnp.float32)
    b = beta.reshape(Cout, 1).astype(jnp.float32)
    scale = g * inv_std                                    # (Cout, 1)
    shift = (b - mean * scale).astype(jnp.float32)         # (Cout, 1)
    w2 = (w32 * scale).astype(compute_dtype)               # BN scale folded into conv

    # -------- Pass 2: recompute conv with the folded weight, add shift (+ swish).
    out3 = pl.pallas_call(
        functools.partial(conv_bn_swish_kernel, swish=swish,
                          compute_dtype=compute_dtype),
        out_shape=jax.ShapeDtypeStruct((N, Cout, HW_pad), out_dtype),
        grid_spec=pltpu.PrefetchScalarGridSpec(
            num_scalar_prefetch=0,
            grid=(N, n_tiles),
            in_specs=[
                pl.BlockSpec((1, Cin, hw_tile), lambda n, t: (n, 0, t)),
                pl.BlockSpec((Cout, Cin), lambda n, t: (0, 0)),
                pl.BlockSpec((Cout, 1), lambda n, t: (0, 0)),
            ],
            out_specs=pl.BlockSpec((1, Cout, hw_tile), lambda n, t: (n, 0, t)),
        ),
        compiler_params=pltpu.CompilerParams(
            dimension_semantics=("parallel", "parallel"),
            vmem_limit_bytes=vmem_limit,
        ),
    )(x, w2, shift)

    if HW_pad != HW:
        out3 = out3[:, :, :HW]
    return out3.reshape(N, Cout, H, W)


# ----------------------------------------------------------------------------
# Pure-JAX reference for sanity checking
# ----------------------------------------------------------------------------
def basic_block_ref(x_nchw, w_oi, gamma, beta, *, swish=False, eps=1e-5):
    y = jnp.einsum("oc,nchw->nohw", w_oi.astype(jnp.float32),
                   x_nchw.astype(jnp.float32))
    mean = jnp.mean(y, axis=(0, 2, 3), keepdims=True)
    var = jnp.mean((y - mean) ** 2, axis=(0, 2, 3), keepdims=True)
    out = (y - mean) / jnp.sqrt(var + eps)
    out = out * gamma[None, :, None, None] + beta[None, :, None, None]
    if swish:
        out = out * jax.nn.sigmoid(out)
    return out


if __name__ == "__main__":
    # Small deterministic setup: N=2, inc=4, outc=8, H=W=16
    key = jax.random.PRNGKey(0)
    kx, kw = jax.random.split(key)

    N, inc, outc, H, W = 2, 4, 8, 16, 16
    x = jax.random.uniform(kx, (N, inc, H, W), dtype=jnp.float32)

    # Conv2d(inc, outc, 1, bias=False) weight: (outc, inc, 1, 1) -> (outc, inc)
    w_conv = jax.random.normal(kw, (outc, inc, 1, 1), dtype=jnp.float32) * 0.1
    w_oi = w_conv[:, :, 0, 0]

    # BatchNorm2d default init: gamma=1, beta=0
    gamma = jnp.ones((outc,), jnp.float32)
    beta = jnp.zeros((outc,), jnp.float32)

    out = basic_block(x, w_oi, gamma, beta, swish=True)
    out = jax.block_until_ready(out)
    assert out.shape == (N, outc, H, W)
    assert out.dtype == x.dtype

    # Tight check against the reference evaluated at the precision the kernel's
    # MXU path actually consumes (bf16-rounded x and w, f32 math).  This isolates
    # the kernel's own error (accumulation order + BN-scale fold re-rounding)
    # from the shared bf16 input quantization.
    xq = x.astype(jnp.bfloat16).astype(jnp.float32)
    wq = w_oi.astype(jnp.bfloat16).astype(jnp.float32)
    ref_q = basic_block_ref(xq, wq, gamma, beta, swish=True)
    assert jnp.allclose(out.astype(jnp.float32), ref_q, atol=4e-2, rtol=4e-2), \
        "mismatch vs bf16-quantized-input reference"

    # Looser sanity check against the exact f32 reference (bf16 compute path,
    # normalized outputs are O(1) so this bounds the absolute bf16 error).
    ref = basic_block_ref(x, w_oi, gamma, beta, swish=True)
    assert jnp.allclose(out.astype(jnp.float32), ref, atol=1e-1, rtol=1e-1), \
        "mismatch vs f32 reference"

    print("KERNEL_OK")
</pallas_src>

<mosaic_0001>
module attributes {stable_mosaic.version = 11 : i64} {
  func.func @conv_stats_kernel(%arg0: i32, %arg1: i32, %arg2: i32, %arg3: memref<1x4x256xf32, #tpu.memory_space<vmem>>, %arg4: memref<8x4xbf16, #tpu.memory_space<vmem>>, %arg5: memref<1x1x8x1xf32, #tpu.memory_space<vmem>>, %arg6: memref<1x1x8x1xf32, #tpu.memory_space<vmem>>) attributes {dimension_semantics = [#tpu.dimension_semantics<parallel>, #tpu.dimension_semantics<parallel>, #tpu.dimension_semantics<arbitrary>], iteration_bounds = array<i64: 2, 1, 1>, scalar_prefetch = 0 : i64, scratch_operands = 0 : i64, tpu.core_type = #tpu.core_type<tc>, window_params = [{transform_indices = @transform_0, window_bounds = array<i64: 1, 4, 256>}, {pipeline_mode = #tpu.pipeline_mode<synchronous>, transform_indices = @transform_1, window_bounds = array<i64: 8, 4>}, {transform_indices = @transform_2, window_bounds = array<i64: 1, 1, 8, 1>}, {transform_indices = @transform_3, window_bounds = array<i64: 1, 1, 8, 1>}]} {
    %c0_i32 = arith.constant 0 : i32
    %0 = arith.cmpi eq, %arg2, %c0_i32 : i32
    %1 = arith.extui %0 : i1 to i32
    %c0_i32_0 = arith.constant 0 : i32
    %2 = arith.cmpi ne, %1, %c0_i32_0 : i32
    scf.if %2 {
      %cst_23 = arith.constant 0.000000e+00 : f32
      %21 = vector.broadcast %cst_23 : f32 to vector<1x1x8x1xf32>
      %c0_24 = arith.constant 0 : index
      %c0_25 = arith.constant 0 : index
      %c0_26 = arith.constant 0 : index
      %c0_27 = arith.constant 0 : index
      %22 = vector.load %arg5[%c0_24, %c0_25, %c0_26, %c0_27] : memref<1x1x8x1xf32, #tpu.memory_space<vmem>>, vector<1x1x8x1xf32>
      tpu.vector_store %arg5[%c0_24, %c0_25, %c0_26, %c0_27], %21 {strides = array<i32>} : memref<1x1x8x1xf32, #tpu.memory_space<vmem>>, vector<1x1x8x1xf32>,
      %cst_28 = arith.constant 0.000000e+00 : f32
      %23 = vector.broadcast %cst_28 : f32 to vector<1x1x8x1xf32>
      %c0_29 = arith.constant 0 : index
      %c0_30 = arith.constant 0 : index
      %c0_31 = arith.constant 0 : index
      %c0_32 = arith.constant 0 : index
      %24 = vector.load %arg6[%c0_29, %c0_30, %c0_31, %c0_32] : memref<1x1x8x1xf32, #tpu.memory_space<vmem>>, vector<1x1x8x1xf32>
      tpu.vector_store %arg6[%c0_29, %c0_30, %c0_31, %c0_32], %23 {strides = array<i32>} : memref<1x1x8x1xf32, #tpu.memory_space<vmem>>, vector<1x1x8x1xf32>,
    } else {
    }
    %c0 = arith.constant 0 : index
    %c0_1 = arith.constant 0 : index
    %c0_2 = arith.constant 0 : index
    %3 = vector.load %arg3[%c0, %c0_1, %c0_2] : memref<1x4x256xf32, #tpu.memory_space<vmem>>, vector<1x4x256xf32>
    %4 = vector.shape_cast %3 : vector<1x4x256xf32> to vector<4x256xf32>
    %5 = arith.truncf %4 : vector<4x256xf32> to vector<4x256xbf16>
    %c0_3 = arith.constant 0 : index
    %c0_4 = arith.constant 0 : index
    %6 = vector.load %arg4[%c0_3, %c0_4] : memref<8x4xbf16, #tpu.memory_space<vmem>>, vector<8x4xbf16>
    %cst = arith.constant dense<0.000000e+00> : vector<8x256xf32>
    %7 = tpu.matmul %6, %5, %cst {dimension_numbers = #tpu.dot_dimension_numbers<[1], [0], [0], [1], [0, 0, 1, 1], [], []>} : vector<8x4xbf16>, vector<4x256xbf16>, vector<8x256xf32> -> vector<8x256xf32>
    %c0_5 = arith.constant 0 : index
    %c0_6 = arith.constant 0 : index
    %c0_7 = arith.constant 0 : index
    %c0_8 = arith.constant 0 : index
    %8 = vector.load %arg5[%c0_5, %c0_6, %c0_7, %c0_8] : memref<1x1x8x1xf32, #tpu.memory_space<vmem>>, vector<1x1x8x1xf32>
    %cst_9 = arith.constant dense<0.000000e+00> : vector<8xf32>
    %9 = vector.multi_reduction <add>, %7, %cst_9 [1] : vector<8x256xf32> to vector<8xf32>
    %10 = vector.shape_cast %9 : vector<8xf32> to vector<8x1xf32>
    %11 = vector.shape_cast %10 : vector<8x1xf32> to vector<1x1x8x1xf32>
    %12 = arith.addf %8, %11 : vector<1x1x8x1xf32>
    %c0_10 = arith.constant 0 : index
    %c0_11 = arith.constant 0 : index
    %c0_12 = arith.constant 0 : index
    %c0_13 = arith.constant 0 : index
    %13 = vector.load %arg5[%c0_10, %c0_11, %c0_12, %c0_13] : memref<1x1x8x1xf32, #tpu.memory_space<vmem>>, vector<1x1x8x1xf32>
    tpu.vector_store %arg5[%c0_10, %c0_11, %c0_12, %c0_13], %12 {strides = array<i32>} : memref<1x1x8x1xf32, #tpu.memory_space<vmem>>, vector<1x1x8x1xf32>,
    %c0_14 = arith.constant 0 : index
    %c0_15 = arith.constant 0 : index
    %c0_16 = arith.constant 0 : index
    %c0_17 = arith.constant 0 : index
    %14 = vector.load %arg6[%c0_14, %c0_15, %c0_16, %c0_17] : memref<1x1x8x1xf32, #tpu.memory_space<vmem>>, vector<1x1x8x1xf32>
    %15 = arith.mulf %7, %7 : vector<8x256xf32>
    %cst_18 = arith.constant dense<0.000000e+00> : vector<8xf32>
    %16 = vector.multi_reduction <add>, %15, %cst_18 [1] : vector<8x256xf32> to vector<8xf32>
    %17 = vector.shape_cast %16 : vector<8xf32> to vector<8x1xf32>
    %18 = vector.shape_cast %17 : vector<8x1xf32> to vector<1x1x8x1xf32>
    %19 = arith.addf %14, %18 : vector<1x1x8x1xf32>
    %c0_19 = arith.constant 0 : index
    %c0_20 = arith.constant 0 : index
    %c0_21 = arith.constant 0 : index
    %c0_22 = arith.constant 0 : index
    %20 = vector.load %arg6[%c0_19, %c0_20, %c0_21, %c0_22] : memref<1x1x8x1xf32, #tpu.memory_space<vmem>>, vector<1x1x8x1xf32>
    tpu.vector_store %arg6[%c0_19, %c0_20, %c0_21, %c0_22], %19 {strides = array<i32>} : memref<1x1x8x1xf32, #tpu.memory_space<vmem>>, vector<1x1x8x1xf32>,
    return
  }
  func.func @transform_0(%arg0: i32, %arg1: i32, %arg2: i32) -> (i32, i32, i32) {
    %c1_i32 = arith.constant 1 : i32
    %0 = arith.muli %arg1, %c1_i32 : i32
    %1 = arith.addi %0, %arg2 : i32
    %c0_i32 = arith.constant 0 : i32
    %c0_i32_0 = arith.constant 0 : i32
    return %arg0, %c0_i32, %1 : i32, i32, i32
  }
  func.func @transform_1(%arg0: i32, %arg1: i32, %arg2: i32) -> (i32, i32) {
    %c0_i32 = arith.constant 0 : i32
    %c0_i32_0 = arith.constant 0 : i32
    %c0_i32_1 = arith.constant 0 : i32
    return %c0_i32, %c0_i32_0 : i32, i32
  }
  func.func @transform_2(%arg0: i32, %arg1: i32, %arg2: i32) -> (i32, i32, i32, i32) {
    %c0_i32 = arith.constant 0 : i32
    %c0_i32_0 = arith.constant 0 : i32
    %c0_i32_1 = arith.constant 0 : i32
    return %arg0, %arg1, %c0_i32, %c0_i32_0 : i32, i32, i32, i32
  }
  func.func @transform_3(%arg0: i32, %arg1: i32, %arg2: i32) -> (i32, i32, i32, i32) {
    %c0_i32 = arith.constant 0 : i32
    %c0_i32_0 = arith.constant 0 : i32
    %c0_i32_1 = arith.constant 0 : i32
    return %arg0, %arg1, %c0_i32, %c0_i32_0 : i32, i32, i32, i32
  }
}

</mosaic_0001>

<bundles_post_ra>
// kernel: tpu_custom_call.1
= control target key start
LH: loop header
LB: loop body
LE: loop exit
PB: predicated region body
PF: predicated region fallthrough
CT: control target
= control target key end

     0   :  { %9 = vsyncpa [#allocation3], 0  ;;  %s769_s0 = inlined_call_operand.hbm [shape: f32[2,4,256], index: 0, kind: input, shape index: {}]   ;;  %s770_s1 = inlined_call_operand.vmem [shape: bf16[8,4], index: 1, kind: input, shape index: {}]   ;;  %s771_s2 = inlined_call_operand.vmem [shape: f32[2,1,8,1], index: 2, kind: output, shape index: {0}]   ;;  %s772_s3 = inlined_call_operand.vmem [shape: f32[2,1,8,1], index: 3, kind: output, shape index: {1}]  }
   0x1   :  { %11 = vsyncpa [#allocation3 + $0x1], 0  ;;  %s634_s12 = smov 0   ;;  %s636_s13 = smov 0  }
   0x2   :  { %s638_s14 = smov 0   ;;  %s640_s15 = smov 0  }
   0x3   :  { %s642_s16 = smov 0   ;;  %s644_s17 = smov 0  }
   0x4 LB: > { %s455_s18 = sadd.s32 4294967295, %s609_s17   ;;  %s36_s19 = sadd.s32 1, %s605_s16  ;;  %s609_s17 = sphi %s644_s17, %s17_s17   ;;  %s605_s16 = sphi %s642_s16, %s782_s16   ;;  %s601_s15 = sphi %s640_s15, %s781_s15   ;;  %s597_s14 = sphi %s638_s14, %s780_s14   ;;  %s593_s13 = sphi %s636_s13, %s779_s13   ;;  %s589_s12 = sphi %s634_s12, %s778_s12  }
   0x5   : > { %p38_p0 = scmp.ge.s32.totalorder %s36_s19, 2  ;;  %s47_s20 = sadd.s32 1, %s597_s14 }
   0x6   : > { %p54_p1 = scmp.ne.s32.totalorder %s597_s14, %s593_s13  ;;  %p55_p2 = scmp.eq.s32.totalorder %s609_s17, 0 }
   0x7   : > { %s784_s19 = smov (%p38_p0, %s36_s19), 0  ;;  %p60_p4 = scmp.ne.s32.totalorder %s593_s13, %s589_s12 }
   0x8   : > { %p670_p3 = por %p55_p2, %p54_p1  ;;  %s42_s22 = ssub.s32 %s605_s16, %s784_s19 }
   0x9   : > { %p61_p5 = scmp.eq.s32.totalorder %s455_s18, 0  ;;  %p45_p6 = scmp.eq.s32.totalorder %s42_s22, 0 }
   0xa   : > { %p477_p8 = scmp.lt.s32.totalorder %s609_s17, 2  ;;  %s164_s25 = sand.u32 1, %s597_s14  }
   0xb   : > { %p677_p7 = por %p61_p5, %p60_p4  ;;  %s470_s26 = sshll.u32 %s605_s16, 7 }
   0xc   : > { %s683_s24 = scalar_select %p45_p6, %s597_s14, %s47_s20  }
   0xd   : > { %s459_s27 = sshll.u32 %s164_s25, 3  ;;  %s690_s30 = scalar_lea.hbm %s769_s0, %s470_s26 }
   0xe   : > { %s168_s4 = scalar_lea.vmem [#allocation2], %s459_s27  ;;  %p694_p9 = pnand %p477_p8, %p670_p3 }
   0xf   : > { %s179_s5 = sshll.u32 %s168_s4, 4  ;;  %s165_s7 = scalar_lea.sflag [#allocation3], %s164_s25  ;;  %s698_s5 = int_to_ptr.vmem [resolvable:$true] %s179_s5 }
  0x10   : > { %s529_s8 = scalar_lea.hbm %s690_s30, 128  ;;  %p531_p13 = pneg %p694_p9 }
  0x11   : > { %p530_p12 = scmp.ne.s32.totalorder %s690_s30, %s529_s8  ;;  %s534_s11 = scalar_lea.hbm %s769_s0, 256 }
  0x12   : > { %p535_p2 = scmp.lt.u32.totalorder %s690_s30, %s769_s0  ;;  %p536_p3 = scmp.lt.u32.totalorder %s534_s11, %s529_s8 }
  0x13   : > { %p532_p0 = pnand %p531_p13, %p530_p12  ;;  %p538_p5 = scmp.lt.u32.totalorder %s529_s8, %s690_s30 }
  0x14   : > { %p537_p4 = por %p536_p3, %p535_p2 }
  0x15   : > { %p533_p1 = pneg %p532_p0 }
  0x16   : > { %p539_p6 = por %p538_p5, %p537_p4 }
  0x18   : > { %p540_p8 = pnand %p539_p6, %p533_p1 }
  0x1a   : > { %543 = shalt.err (!%p540_p8)
}
  0x1b   : > { %s544_s20 = scalar_lea.vmem %s698_s5, 128  ;;  %s611_s21 = smov [#allocation2]  }
  0x1c   : > { %p545_p12 = scmp.ne.s32.totalorder %s698_s5, %s544_s20  ;;  %s549_s22 = sshll.u32 %s611_s21, 4  ;;  %s550_s22 = int_to_ptr.vmem [resolvable:$false] %s549_s22 }
  0x1d   : > { %s551_s25 = scalar_lea.vmem %s550_s22, 256  ;;  %p552_p11 = scmp.lt.s32.totalorder %s698_s5, %s550_s22 }
  0x1e   : > { %p547_p0 = pnand %p545_p12, %p531_p13  ;;  %p553_p2 = scmp.lt.s32.totalorder %s551_s25, %s544_s20 }
  0x20   : > { %p548_p10 = pneg %p547_p0  ;;  %p554_p3 = por %p553_p2, %p552_p11 }
  0x22   : > { %p555_p4 = pnand %p554_p3, %p548_p10 }
  0x24   : > { %558 = shalt.err (!%p555_p4)
}
  0x25   : > { %476 = dma.hbm_to_vmem [thread:$0]  (!%p694_p9), %s690_s30, 128, %s698_s5, %s165_s7  }
  0x26   : > { %p776_p1 = scmp.lt.s32.totalorder %s609_s17, 3  ;;  %p777_p5 = scmp.ge.s32.totalorder %s609_s17, 1 }
  0x28   : > { %p185_p13 = pnand %p777_p5, %p776_p1 }
  0x29   : > { %s190_s26 = sand.u32 (!%p185_p13), 1, %s593_s13  }
  0x2a   : > { %188 = sbr.rel (%p185_p13) target bundleno = 423 (0x1a7), region = 28  ;;  %s463_s27 = sshll.u32 (!%p185_p13), %s190_s26, 3 }
  0x2b   : > { %s191_s28 = scalar_lea.sflag (!%p185_p13), [#allocation3], %s190_s26  ;;  %s194_s29 = scalar_lea.vmem (!%p185_p13), [#allocation2], %s463_s27 }
  0x31   : > { %584 = dma.done.wait (%p677_p7), %s191_s28, 128  }
  0x32   : > { %586 = vsyncadd (%p677_p7), %s191_s28, 4294967168  ;;  %v612_v0 = vmov 0   ;;  %v250_v1 = vld [vmem:[%s194_s29] sm:$0xff]  ;;  %vm261_vm0 = vcmask 1041408   ;;  %vm257_vm1 = vcmask 31744   ;;  %p228_p9 = scmp.lt.s32.totalorder %s601_s15, 1 }
  0x33   : > { %300 = vmatprep.mubr.bf16.mxu0 %v612_v0  ;;  %v252_v2 = vcombine.high %v250_v1, %v250_v1  ;;  %v254_v3 = vpack.c.bf16 %v250_v1, %v250_v1  ;;  %v256_v6 = vld [vmem:[%s770_s1] sm:$0xf]  ;;  %vm247_vm2 = vcmask 7168   ;;  %v613_v7 = vmov 0.0  }
  0x34   : > { %s786_s15 = smov (!%p228_p9, %s601_s15), 1 }
  0x35   : > { %v255_v4 = vpack.c.bf16 %v252_v2, %v252_v2  ;;  %v263_v5 = vsel %vm261_vm0, %v254_v3, 0  ;;  %s464_s23 = sshll.u32 %s786_s15, 3 }
  0x36   : > { %s234_s7 = scalar_lea.vmem %s771_s2, %s464_s23  ;;  %s241_s15 = scalar_lea.vmem %s772_s3, %s464_s23 }
  0x37   : > { %466 = vmatprep.subr.msk.bf16.mxu0 %vm261_vm0, %v255_v4  ;;  %248 = vst.msk [vmem:[%s234_s7] sm:$0xff] %vm247_vm2, %v613_v7  ;;  %249 = vst.msk [vmem:[%s241_s15] sm:$0xff] %vm247_vm2, %v613_v7 }
  0x38   : > { %269 = vmatpush1.bf16.msra.mxu0 %v263_v5 }
  0x3b   : > { %467 = vmatmul.mubr.msk.bf16.vlgmr.msra.gmra.mrb[0].mxu0 %vm257_vm1, %v256_v6 }
  0x3e   : > { %v309_v16 = vld [vmem:[%s234_s7] sm:$0xff] }
  0x3f   : > { %v316_v19 = vld [vmem:[%s241_s15] sm:$0xff] }
 0x10e   : > { %v302_v8 = vpop.f32.mrb[0].mxu0 }
 0x10f   : > { %v317_v9 = vmul.f32 %v302_v8, %v302_v8  ;;  %v304_v10 = vpop.f32.mrb[1].mxu0 }
 0x110   : > { %v318_v11 = vmul.f32 %v304_v10, %v304_v10  ;;  %v306_v12 = vpop.f32.mrb[2].mxu0  ;;  %v310_v13 = vadd.f32 %v304_v10, %v302_v8 }
 0x111   : > { %v307_v14 = vpop.f32.mrb[3].mxu0 }
 0x112   : > { %311 = vadd.xlane.f32.xlu0 %v310_v13  ;;  %v319_v15 = vadd.f32 %v318_v11, %v317_v9 }
 0x116   : > { %320 = vadd.xlane.f32.xlu0 %v319_v15 }
 0x19f   : > { %v312_v17 = vpop.xlane.xlu0 %311 }
 0x1a0   : > { %v313_v18 = vadd.f32 %v312_v17, %v309_v16 }
 0x1a2   : > { %315 = vst.msk [vmem:[%s234_s7] sm:$0xff] %vm247_vm2, %v313_v18 }
 0x1a3   : > { %v321_v20 = vpop.xlane.xlu0 %320 }
 0x1a4   : > { %v322_v21 = vadd.f32 %v321_v20, %v316_v19 }
 0x1a6   : > { %323 = vst.msk [vmem:[%s241_s15] sm:$0xff] %vm247_vm2, %v322_v21 }
 0x1a7 PF: > { %s17_s17 = sadd.s32 1, %s609_s17   ;;  %s778_s12 = smov %s593_s13 }
 0x1a8   : > { %p14_p7 = scmp.ge.s32.totalorder %s17_s17, 4   ;;  %s779_s13 = smov %s597_s14 }
 0x1a9   : > { %s780_s14 = smov %s683_s24  ;;  %s781_s15 = smov %s605_s16 }
 0x1aa   : > { %s782_s16 = smov %s784_s19  ;;  %16 = sbr.rel (!%p14_p7) target bundleno = 4 (0x4), region = 84 }
 0x1b1   :  { %369 = vsyncpa [#allocation3], 1 }
 0x1b2   :  { %371 = vsyncpa [#allocation3 + $0x1], 1 }

</bundles_post_ra>
